<compile_context>
chip_gen: v6e
topology: v6e:2x2x1
jax: 0.10.0
libtpu: 0.0.40
codegen_flags: <defaults>
</compile_context>

<pallas_src>
import functools

import jax
import jax.numpy as jnp
from jax.experimental import pallas as pl
from jax.experimental.pallas import tpu as pltpu

F_U, F_V, N, HIDDEN, NC, NUM_LAYERS = 16, 16, 8, 32, 1, 2


def _vmem():
    return pl.BlockSpec(memory_space=pltpu.MemorySpace.VMEM)


# TODO(synk): SynOmicsLayer source is not included in the provided module; it is
# implemented here as a standard bipartite GCN message-passing layer
#   h_u = relu(W_u @ (A_u @ x_u + A_uv @ x_v)),  h_v = relu(W_v @ (A_v @ x_v + A_uv.T @ x_u))
# The outer SynOmics.forward semantics (layer loop, cat, transpose,
# fc -> relu -> fc2 -> sigmoid / softmax(dim=0)) are reproduced exactly.
def synomics_fused_kernel(y0_ref, m_stack_ref, head1_ref, head2_ref, out_ref,
                          *, num_layers, f_tot, hidden, nc):
    # Sample-major working layout throughout: y = [x_u; x_v].T -> (N, F_tot).
    y = y0_ref[...]

    # Each layer is a single MXU matmul with the folded matrix
    #   M_l = (blockdiag(W_u, W_v) @ A_full).T  (precomputed on the host).
    for l in range(num_layers):                   # static unroll, num_layers is tiny
        y = jnp.maximum(
            jnp.dot(y, m_stack_ref[l], preferred_element_type=jnp.float32), 0.0)

    # Classification head; biases are packed as the last row of each weight slab.
    w_fc_t = head1_ref[:f_tot, :]                 # (F_tot, hidden) = fc.weight.T
    b_fc = head1_ref[f_tot:, :]                   # (1, hidden)
    h = jnp.maximum(
        jnp.dot(y, w_fc_t, preferred_element_type=jnp.float32) + b_fc, 0.0)

    w_fc2_t = head2_ref[:hidden, :]               # (hidden, nc) = fc2.weight.T
    b_fc2 = head2_ref[hidden:, :]                 # (1, nc)
    z = jnp.dot(h, w_fc2_t, preferred_element_type=jnp.float32) + b_fc2

    if nc > 2:
        # nn.Softmax(dim=0): normalize across the sample axis (all N in-block).
        m = jnp.max(z, axis=0, keepdims=True)
        e = jnp.exp(z - m)
        z = e / jnp.sum(e, axis=0, keepdims=True)
    else:
        z = jax.nn.sigmoid(z)

    # Single lane-dense output slab: [ last-layer features | predictions ].
    out_ref[...] = jnp.concatenate([y, z], axis=1)


def synomics_forward(params, x_u, x_v, a_u, a_v, a_uv, nc=NC):
    f_u, n = x_u.shape
    f_v = x_v.shape[0]
    f_tot = f_u + f_v
    hidden = params["w_fc"].shape[0]
    num_layers = len(params["layers"])

    # Host-side, loop-invariant precompute (constant-folds / fuses under jit):
    # fold each layer's (W_blockdiag @ A_full) into one pre-transposed matrix,
    # pack biases into the pre-transposed head weight slabs, and move the
    # concat+transpose of the inputs out of the kernel.
    a_full = jnp.block([[a_u, a_uv], [a_uv.T, a_v]])                 # (F_tot, F_tot)
    zuv = jnp.zeros((f_u, f_v), jnp.float32)
    zvu = jnp.zeros((f_v, f_u), jnp.float32)
    m_stack = jnp.stack(
        [(jnp.block([[w_u, zuv], [zvu, w_v]]) @ a_full).T
         for (w_u, w_v) in params["layers"]], axis=0)                 # (L, F_tot, F_tot)
    head1 = jnp.concatenate(
        [params["w_fc"].T, params["b_fc"].reshape(1, -1)], axis=0)    # (F_tot+1, hidden)
    head2 = jnp.concatenate(
        [params["w_fc2"].T, params["b_fc2"].reshape(1, -1)], axis=0)  # (hidden+1, nc)
    y0 = jnp.concatenate([x_u, x_v], axis=0).T                        # (N, F_tot)

    nc_out = params["w_fc2"].shape[0]
    kernel = functools.partial(
        synomics_fused_kernel, num_layers=num_layers, f_tot=f_tot,
        hidden=hidden, nc=nc)
    out_slab = pl.pallas_call(
        kernel,
        out_shape=jax.ShapeDtypeStruct((n, f_tot + nc_out), jnp.float32),
        in_specs=[_vmem()] * 4,
        out_specs=_vmem(),
    )(y0, m_stack, head1, head2)

    # Wrapper-side layout plumbing back to the PyTorch return convention.
    feats = out_slab[:, :f_tot]                                       # (N, F_tot)
    preds = out_slab[:, f_tot:]                                       # (N, nc)
    h_u = feats[:, :f_u].T                                            # (F_u, N)
    h_v = feats[:, f_u:].T                                            # (F_v, N)
    return preds, h_u, h_v


# Pure-JAX reference (same assumed layer math) for a correctness sanity check.
def reference_forward(params, x_u, x_v, a_u, a_v, a_uv, nc=NC):
    for (w_u, w_v) in params["layers"]:
        agg_u = a_u @ x_u + a_uv @ x_v
        agg_v = a_v @ x_v + a_uv.T @ x_u
        x_u = jnp.maximum(w_u @ agg_u, 0.0)
        x_v = jnp.maximum(w_v @ agg_v, 0.0)
    x = jnp.concatenate([x_u, x_v], axis=0).T
    h = jnp.maximum(x @ params["w_fc"].T + params["b_fc"], 0.0)
    z = h @ params["w_fc2"].T + params["b_fc2"]
    z = jax.nn.softmax(z, axis=0) if nc > 2 else jax.nn.sigmoid(z)
    return z, x_u, x_v


def init_params(key, f_u, f_v, hidden, nc, num_layers):
    keys = jax.random.split(key, 2 * num_layers + 4)
    layers = []
    for i in range(num_layers):
        su = 1.0 / (f_u ** 0.5)
        sv = 1.0 / (f_v ** 0.5)
        w_u = jax.random.uniform(keys[2 * i], (f_u, f_u), jnp.float32, -su, su)
        w_v = jax.random.uniform(keys[2 * i + 1], (f_v, f_v), jnp.float32, -sv, sv)
        layers.append((w_u, w_v))
    f_tot = f_u + f_v
    s1 = 1.0 / (f_tot ** 0.5)
    s2 = 1.0 / (hidden ** 0.5)
    return {
        "layers": layers,
        "w_fc": jax.random.uniform(keys[-4], (hidden, f_tot), jnp.float32, -s1, s1),
        "b_fc": jax.random.uniform(keys[-3], (hidden,), jnp.float32, -s1, s1),
        "w_fc2": jax.random.uniform(keys[-2], (nc, hidden), jnp.float32, -s2, s2),
        "b_fc2": jax.random.uniform(keys[-1], (nc,), jnp.float32, -s2, s2),
    }


if __name__ == "__main__":
    key = jax.random.PRNGKey(0)
    k_xu, k_xv, k_au, k_av, k_auv, k_params = jax.random.split(key, 6)

    x_u = jax.random.normal(k_xu, (F_U, N), jnp.float32)
    x_v = jax.random.normal(k_xv, (F_V, N), jnp.float32)
    a_u = (jax.random.uniform(k_au, (F_U, F_U)) > 0.5).astype(jnp.float32)
    a_v = (jax.random.uniform(k_av, (F_V, F_V)) > 0.5).astype(jnp.float32)
    a_uv = (jax.random.uniform(k_auv, (F_U, F_V)) > 0.5).astype(jnp.float32)

    params = init_params(k_params, F_U, F_V, HIDDEN, NC, NUM_LAYERS)

    out, h_u, h_v = synomics_forward(params, x_u, x_v, a_u, a_v, a_uv, nc=NC)
    jax.block_until_ready((out, h_u, h_v))

    assert out.shape == (N, NC)
    assert h_u.shape == (F_U, N) and h_v.shape == (F_V, N)

    ref_out, ref_u, ref_v = reference_forward(params, x_u, x_v, a_u, a_v, a_uv, nc=NC)
    assert jnp.allclose(out, ref_out, rtol=1e-2, atol=1e-2)
    assert jnp.allclose(h_u, ref_u, rtol=1e-2, atol=1e-2)
    assert jnp.allclose(h_v, ref_v, rtol=1e-2, atol=1e-2)

    print("KERNEL_OK")
</pallas_src>

<mosaic_0001>
module attributes {stable_mosaic.version = 11 : i64} {
  func.func @synomics_fused_kernel(%arg0: memref<8x32xf32, #tpu.memory_space<vmem>>, %arg1: memref<2x32x32xf32, #tpu.memory_space<vmem>>, %arg2: memref<33x32xf32, #tpu.memory_space<vmem>>, %arg3: memref<33x1xf32, #tpu.memory_space<vmem>>, %arg4: memref<8x33xf32, #tpu.memory_space<vmem>>) attributes {dimension_semantics = [], scalar_prefetch = 0 : i64, scratch_operands = 0 : i64, tpu.core_type = #tpu.core_type<tc>} {
    %c0 = arith.constant 0 : index
    %c0_0 = arith.constant 0 : index
    %0 = vector.load %arg0[%c0, %c0_0] : memref<8x32xf32, #tpu.memory_space<vmem>>, vector<8x32xf32>
    %c0_1 = arith.constant 0 : index
    %c0_2 = arith.constant 0 : index
    %c0_3 = arith.constant 0 : index
    %1 = vector.load %arg1[%c0_1, %c0_2, %c0_3] : memref<2x32x32xf32, #tpu.memory_space<vmem>>, vector<1x32x32xf32>
    %2 = vector.shape_cast %1 : vector<1x32x32xf32> to vector<32x32xf32>
    %cst = arith.constant dense<0.000000e+00> : vector<8x32xf32>
    %3 = tpu.matmul %0, %2, %cst {dimension_numbers = #tpu.dot_dimension_numbers<[1], [0], [0], [1], [0, 0, 1, 1], [], []>} : vector<8x32xf32>, vector<32x32xf32>, vector<8x32xf32> -> vector<8x32xf32>
    %cst_4 = arith.constant 0.000000e+00 : f32
    %4 = vector.broadcast %cst_4 : f32 to vector<8x32xf32>
    %5 = arith.maximumf %3, %4 : vector<8x32xf32>
    %c1 = arith.constant 1 : index
    %c0_5 = arith.constant 0 : index
    %c0_6 = arith.constant 0 : index
    %6 = vector.load %arg1[%c1, %c0_5, %c0_6] : memref<2x32x32xf32, #tpu.memory_space<vmem>>, vector<1x32x32xf32>
    %7 = vector.shape_cast %6 : vector<1x32x32xf32> to vector<32x32xf32>
    %cst_7 = arith.constant dense<0.000000e+00> : vector<8x32xf32>
    %8 = tpu.matmul %5, %7, %cst_7 {dimension_numbers = #tpu.dot_dimension_numbers<[1], [0], [0], [1], [0, 0, 1, 1], [], []>} : vector<8x32xf32>, vector<32x32xf32>, vector<8x32xf32> -> vector<8x32xf32>
    %cst_8 = arith.constant 0.000000e+00 : f32
    %9 = vector.broadcast %cst_8 : f32 to vector<8x32xf32>
    %10 = arith.maximumf %8, %9 : vector<8x32xf32>
    %c0_9 = arith.constant 0 : index
    %c0_10 = arith.constant 0 : index
    %11 = vector.load %arg2[%c0_9, %c0_10] : memref<33x32xf32, #tpu.memory_space<vmem>>, vector<32x32xf32>
    %c32 = arith.constant 32 : index
    %c0_11 = arith.constant 0 : index
    %12 = vector.load %arg2[%c32, %c0_11] : memref<33x32xf32, #tpu.memory_space<vmem>>, vector<1x32xf32>
    %cst_12 = arith.constant dense<0.000000e+00> : vector<8x32xf32>
    %13 = tpu.matmul %10, %11, %cst_12 {dimension_numbers = #tpu.dot_dimension_numbers<[1], [0], [0], [1], [0, 0, 1, 1], [], []>} : vector<8x32xf32>, vector<32x32xf32>, vector<8x32xf32> -> vector<8x32xf32>
    %14 = vector.broadcast %12 : vector<1x32xf32> to vector<8x32xf32>
    %15 = arith.addf %13, %14 : vector<8x32xf32>
    %cst_13 = arith.constant 0.000000e+00 : f32
    %16 = vector.broadcast %cst_13 : f32 to vector<8x32xf32>
    %17 = arith.maximumf %15, %16 : vector<8x32xf32>
    %c0_14 = arith.constant 0 : index
    %c0_15 = arith.constant 0 : index
    %18 = vector.load %arg3[%c0_14, %c0_15] : memref<33x1xf32, #tpu.memory_space<vmem>>, vector<32x1xf32>
    %c32_16 = arith.constant 32 : index
    %c0_17 = arith.constant 0 : index
    %19 = vector.load %arg3[%c32_16, %c0_17] : memref<33x1xf32, #tpu.memory_space<vmem>>, vector<1x1xf32>
    %cst_18 = arith.constant dense<0.000000e+00> : vector<8x1xf32>
    %20 = tpu.matmul %17, %18, %cst_18 {dimension_numbers = #tpu.dot_dimension_numbers<[1], [0], [0], [1], [0, 0, 1, 1], [], []>} : vector<8x32xf32>, vector<32x1xf32>, vector<8x1xf32> -> vector<8x1xf32>
    %21 = vector.broadcast %19 : vector<1x1xf32> to vector<8x1xf32>
    %22 = arith.addf %20, %21 : vector<8x1xf32>
    %23 = arith.negf %22 : vector<8x1xf32>
    %24 = math.exp %23 : vector<8x1xf32>
    %cst_19 = arith.constant 1.000000e+00 : f32
    %25 = vector.broadcast %cst_19 : f32 to vector<8x1xf32>
    %26 = arith.addf %25, %24 : vector<8x1xf32>
    %27 = arith.divf %25, %26 : vector<8x1xf32>
    %28 = tpu.concatenate %10, %27 in 1 : vector<8x32xf32>, vector<8x1xf32> -> vector<8x33xf32>
    %c0_20 = arith.constant 0 : index
    %c0_21 = arith.constant 0 : index
    %29 = vector.load %arg4[%c0_20, %c0_21] : memref<8x33xf32, #tpu.memory_space<vmem>>, vector<8x33xf32>
    tpu.vector_store %arg4[%c0_20, %c0_21], %28 {strides = array<i32>} : memref<8x33xf32, #tpu.memory_space<vmem>>, vector<8x33xf32>,
    return
  }
}

</mosaic_0001>

<bundles_post_ra>
// kernel: tpu_custom_call.1
= control target key start
LH: loop header
LB: loop body
LE: loop exit
PB: predicated region body
PF: predicated region fallthrough
CT: control target
= control target key end

     0   :  { %v474_v1 = vmov 0.0   ;;  %vm475_vm0 = vmmov 0   ;;  %s572_s0 = inlined_call_operand.vmem [shape: f32[8,32], index: 0, kind: input, shape index: {}]   ;;  %s573_s1 = inlined_call_operand.vmem [shape: f32[2,32,32], index: 1, kind: input, shape index: {}]   ;;  %s574_s2 = inlined_call_operand.vmem [shape: f32[33,32], index: 2, kind: input, shape index: {}]   ;;  %s575_s3 = inlined_call_operand.vmem [shape: f32[33,1], index: 3, kind: input, shape index: {}]   ;;  %s576_s4 = inlined_call_operand.hbm [shape: f32[8,33], index: 4, kind: output, shape index: {}]  }
   0x1   :  { %v22_v0 = vld [vmem:[%s573_s1 + $0x18] sm:$0xff]  ;;  %400 = vmatprep.subr.mxu0 %v474_v1  ;;  %v21_v2 = vld [vmem:[%s573_s1 + $0x10] sm:$0xff]  ;;  %408 = vmatprep.mubr.msk.f32.mxu0 %vm475_vm0, %v474_v1 }
   0x2   :  { %v373_v3 = vld [vmem:[%s573_s1 + $0x38] sm:$0xff]  ;;  %401 = vmatpush3.msra.mxu0 %v22_v0  ;;  %411 = vmatprep.subr.mxu1 %v474_v1  ;;  %v372_v4 = vld [vmem:[%s573_s1 + $0x30] sm:$0xff] }
   0x3   :  { %9 = vsyncpa [#allocation3], 0  ;;  %402 = vmatprep.subr.mxu0 %v474_v1  ;;  %v20_v5 = vld [vmem:[%s573_s1 + $0x8] sm:$0xff]  ;;  %412 = vmatpush3.msra.mxu1 %v373_v3  ;;  %v19_v6 = vld [vmem:[%s573_s1] sm:$0xff]  ;;  %vm23_vm1 = vcmask 261120   ;;  %s477_s25 = smov [#allocation2]  }
   0x4   :  { %403 = vmatpush3.msra.mxu0 %v21_v2  ;;  %413 = vmatprep.subr.mxu1 %v474_v1  ;;  %v18_v7 = vld [vmem:[%s572_s0] sm:$0xff]  ;;  %v371_v8 = vld [vmem:[%s573_s1 + $0x28] sm:$0xff]  ;;  %v180_v10 = vld [vmem:[%s574_s2 + $0x18] sm:$0xff]  ;;  %s361_s26 = sshll.u32 %s477_s25, 4  ;;  %vm353_vm2 = vcmask 269312   ;;  %s362_s26 = int_to_ptr.vmem [resolvable:$true] %s361_s26 }
   0x5   :  { %404 = vmatprep.subr.mxu0 %v474_v1  ;;  %414 = vmatpush3.msra.mxu1 %v372_v4  ;;  %v370_v9 = vld [vmem:[%s573_s1 + $0x20] sm:$0xff]  ;;  %v179_v11 = vld [vmem:[%s574_s2 + $0x10] sm:$0xff]  ;;  %v178_v15 = vld [vmem:[%s574_s2 + $0x8] sm:$0xff]  ;;  %p457_p1 = scmp.lt.s32.totalorder %s362_s26, %s362_s26 }
   0x6   :  { %405 = vmatpush3.msra.mxu0 %v20_v5  ;;  %415 = vmatprep.subr.mxu1 %v474_v1  ;;  %v177_v16 = vld [vmem:[%s574_s2] sm:$0xff]  ;;  %v263_v17 = vld [vmem:[%s575_s3 + $0x18] sm:$0xff]  ;;  %v262_v21 = vld [vmem:[%s575_s3 + $0x10] sm:$0xff] }
   0x7   :  { %406 = vmatprep.subr.mxu0 %v474_v1  ;;  %419 = vmatprep.mubr.msk.f32.mxu1 %vm475_vm0, %v474_v1  ;;  %v261_v22 = vld [vmem:[%s575_s3 + $0x8] sm:$0xff]  ;;  %v260_v23 = vld [vmem:[%s575_s3] sm:$0xff] }
   0x8   :  { %407 = vmatpush3.msra.mxu0 %v19_v6  ;;  %416 = vmatpush3.msra.mxu1 %v371_v8  ;;  %v375_v24 = vld [vmem:[%s574_s2 + $0x20] ss:$0 sm:$0xff]  ;;  %s476_s2 = smov 32  }
   0x9   :  { %409 = vmatmul.mubr.msk.f32.vlgmr.msra.gmra.mxu0 %vm23_vm1, %v18_v7  ;;  %422 = vmatprep.subr.mxu0 %v474_v1  ;;  %v377_v29 = vld [vmem:[%s575_s3 + $0x20] ss:$0 sm:$0xff]  ;;  %s452_s3 = scalar_lea.vmem %s362_s26, 128 }
   0xa   :  { %430 = vmatprep.mubr.msk.f32.mxu0 %vm475_vm0, %v474_v1  ;;  %417 = vmatprep.subr.mxu1 %v474_v1  ;;  %p453_p0 = scmp.ne.s32.totalorder %s362_s26, %s452_s3  ;;  %p458_p2 = scmp.lt.s32.totalorder %s452_s3, %s452_s3 }
   0xb   :  { %418 = vmatpush3.msra.mxu1 %v370_v9  ;;  %423 = vmatpush3.msra.mxu0 %v180_v10 }
   0xc   :  { %433 = vmatprep.subr.mxu1 %v474_v1  ;;  %424 = vmatprep.subr.mxu0 %v474_v1  ;;  %p459_p3 = por %p458_p2, %p457_p1 }
   0xd   :  { %425 = vmatpush3.msra.mxu0 %v179_v11 }
   0xe   :  { %426 = vmatprep.subr.mxu0 %v474_v1  ;;  %p460_p4 = pnand %p459_p3, %p453_p0 }
   0xf   :  { %427 = vmatpush3.msra.mxu0 %v178_v15 }
  0x10   :  { %428 = vmatprep.subr.mxu0 %v474_v1 }
  0x11   :  { %429 = vmatpush3.msra.mxu0 %v177_v16 }
  0xc9   :  { %v93_v12 = vpop.f32.mrf.mxu0 }
  0xca   :  { %v97_v13 = vmax.f32 %v93_v12, 0.0 }
  0xcb   :  { %v410_v14 = vpop.f32.mrf.mxu0 }
  0xcc   :  { %420 = vmatmul.mubr.msk.f32.vlgmr.msra.gmra.mxu1 %vm23_vm1, %v97_v13 }
  0xcd   :  { %441 = vmatprep.mubr.msk.f32.mxu1 %vm475_vm0, %v474_v1  ;;  %434 = vmatpush3.msra.mxu1 %v263_v17 }
  0xce   :  { %435 = vmatprep.subr.mxu1 %v474_v1 }
  0xcf   :  { %436 = vmatpush3.msra.mxu1 %v262_v21 }
  0xd0   :  { %437 = vmatprep.subr.mxu1 %v474_v1 }
  0xd1   :  { %438 = vmatpush3.msra.mxu1 %v261_v22 }
  0xd2   :  { %439 = vmatprep.subr.mxu1 %v474_v1 }
  0xd3   :  { %440 = vmatpush3.msra.mxu1 %v260_v23 }
 0x18c   :  { %v172_v18 = vpop.f32.mrf.mxu1 }
 0x18d   :  { %v176_v19 = vmax.f32 %v172_v18, 0.0 }
 0x18e   :  { %v421_v20 = vpop.f32.mrf.mxu1 }
 0x18f   :  { %431 = vmatmul.mubr.msk.f32.vlgmr.msra.gmra.mxu0 %vm23_vm1, %v176_v19 }
 0x24f   :  { %v255_v25 = vpop.f32.mrf.mxu0 }
 0x250   :  { %v256_v26 = vadd.f32 %v375_v24, %v255_v25 }
 0x251   :  { %v432_v27 = vpop.f32.mrf.mxu0 }
 0x252   :  { %v259_v28 = vmax.f32 %v256_v26, 0.0 }
 0x254   :  { %442 = vmatmul.mubr.msk.f32.vlgmr.msra.gmra.mxu1 %vm23_vm1, %v259_v28 }
 0x314   :  { %v338_v30 = vpop.f32.mrf.mxu1 }
 0x315   :  { %v339_v31 = vadd.f32 %v377_v29, %v338_v30 }
 0x316   :  { %v443_v32 = vpop.f32.mrf.mxu1 }
 0x317   :  { %v379_v33 = vmul.f32 -1.442695, %v339_v31 }
 0x319   :  { %448 = vpow2.f32 %v379_v33 }
 0x326   :  { %v449_v34 = vpop.eup %448 }
 0x327   :  { %v345_v35 = vadd.f32 1.0, %v449_v34 }
 0x329   :  { %450 = vrcp.f32 %v345_v35 }
 0x336   :  { %v451_v36 = vpop.eup %450 }
 0x337   :  { %349 = vrot.lane.b32.xlu0 %v451_v36, %s476_s2 }
 0x3a9   :  { %v350_v37 = vpop.permute.xlu0 %349 }
 0x3aa   :  { %v352_v38 = vsel %vm23_vm1, %v176_v19, %v350_v37 }
 0x3ab   :  { %354 = vst.msk [vmem:[#allocation2] sm:$0xff] %vm353_vm2, %v352_v38 }
 0x3ac   :  { %463 = shalt.err (!%p460_p4)
}
 0x3ad   :  { %364 = dma.vmem_to_hbm [thread:$0]  %s362_s26, 128, %s576_s4, [#allocation3]  }
 0x3ae   :  { %472 = dma.done.wait [#allocation3], 128  }
 0x3af   :  { %473 = vsyncadd [#allocation3], 4294967168 }
 0x3b0   :  { %368 = vsyncpa [#allocation3], 1 }

</bundles_post_ra>
